<compile_context>
chip_gen: v7x
topology: tpu7x:2x2x1
jax: 0.10.0
libtpu: 0.0.40
codegen_flags: <defaults>
</compile_context>

<pallas_src>
import math

import jax
import jax.numpy as jnp
from jax.experimental import pallas as pl
from jax.experimental.pallas import tpu as pltpu


MIN_GRID_STEPS = 4  # enough steps for DMA overlap + both v7x TensorCores


def _dropout_mul_kernel(x_ref, m_ref, o_ref):
    # path A: x (Nb, tT, Cf) * m (Nb, 1, Cf)  -> sublane-splat broadcast
    # path B: x (Nb, W)      * m (Nb, W)      -> plain elementwise vmul
    o_ref[...] = x_ref[...] * m_ref[...]


def _cdiv(a, b):
    return -(-a // b)


def _round_up(x, m):
    return (x + m - 1) // m * m


def _divisors(n):
    ds = []
    i = 1
    while i * i <= n:
        if n % i == 0:
            ds.append(i)
            if i != n // i:
                ds.append(n // i)
        i += 1
    return sorted(ds)


def _sublane_align(itemsize):
    # Native sublane tile height: 8 (f32), 16 (bf16), 32 (int8).
    return 8 * max(1, 4 // itemsize)


def _vmem_budget():
    """(per-block byte target, scoped vmem_limit_bytes) -- generation dependent."""
    cap = None
    try:
        info = pltpu.get_tpu_info()
        cap = getattr(info, "vmem_capacity_bytes", None)
    except Exception:
        cap = None
    if cap is None:
        cap = 64 * 1024 * 1024  # conservative (v7x-sized) default
    if cap >= 96 * 1024 * 1024:
        # v5e / v6e: 128 MiB physical VMEM -> big blocks; raise the scoped
        # limit past v5e's 16 MiB default.
        return 8 * 1024 * 1024, 64 * 1024 * 1024
    # v7x: 64 MiB VMEM per TensorCore -> smaller blocks, stay <= 32 MiB scoped.
    return 3 * 1024 * 1024, 32 * 1024 * 1024


def _fold_factor(T, C, sub_align):
    """f dividing T with (f*C) % 128 == 0, preferring sublane-aligned T//f.
    Returns None when no such f exists (caller uses the flattened path)."""
    cands = [f for f in _divisors(T) if (f * C) % 128 == 0]
    if not cands:
        return None
    aligned = [f for f in cands if (T // f) % sub_align == 0]
    return min(aligned) if aligned else min(cands)


def _choose_block_3d(N, Tf, Cf, itemsize, target_bytes):
    """Pick (Nb, tT) for blocks (Nb, tT, Cf): >=MIN_GRID_STEPS steps preferred,
    then the largest block that fits target_bytes (VMEM-padded accounting)."""
    sub_align = _sublane_align(itemsize)
    tT_opts = [d for d in _divisors(Tf) if d % sub_align == 0 or d == Tf]
    best = None
    for Nb in _divisors(N):
        for tT in tT_opts:
            padded = Nb * _round_up(tT, sub_align) * Cf * itemsize
            if padded > target_bytes:
                continue
            steps = (N // Nb) * (Tf // tT)
            key = (min(steps, MIN_GRID_STEPS), padded)
            if best is None or key > best[0]:
                best = (key, Nb, tT, padded)
    if best is None:
        # Even a single-row-group block is over budget; take the smallest legal one.
        tT = min(tT_opts)
        return 1, tT, _round_up(tT, sub_align) * Cf * itemsize
    return best[1], best[2], best[3]


def _choose_block_2d(N, TC, C, itemsize, target_bytes):
    """Flattened path: pick (Nb, W). W is a multiple of lcm(C, 128) (lane-dense
    and mask-periodic) unless the whole row fits in one block."""
    sub_align = _sublane_align(itemsize)
    Nb = N if N < sub_align else sub_align          # full-N or multiple of 8
    rows_padded = _round_up(Nb, sub_align)
    base = (C * 128) // math.gcd(C, 128)            # lcm(C, 128)
    if base >= TC:
        W = TC                                      # single full-width block
    else:
        k_max = TC // base
        k_fit = max(1, target_bytes // (rows_padded * base * itemsize))
        k = min(k_fit, k_max)
        batch_steps = _cdiv(N, Nb)
        while k > 1 and batch_steps * _cdiv(TC, k * base) < MIN_GRID_STEPS:
            k -= 1
        W = k * base
    padded = rows_padded * _round_up(W, 128) * itemsize
    return Nb, W, padded


def spatial_dropout1d(x, *, p=0.5, seed=0, training=True, donate_input=False):
    """Forward pass of SpatialDropout1D. x: (N, T, C)."""
    assert 0.0 <= p <= 1.0, "dropout probability must be in [0, 1]"
    if not training or p == 0.0:
        return x                      # eval mode / p=0: identity
    if p >= 1.0:
        return jnp.zeros_like(x)      # matches nn.Dropout2d(p=1) in training

    N, T, C = x.shape
    itemsize = jnp.dtype(x.dtype).itemsize
    sub_align = _sublane_align(itemsize)
    target_bytes, vmem_limit = _vmem_budget()

    # Per-(n, c) keep mask, pre-scaled by 1/(1-p); identical for every t.
    key = jax.random.PRNGKey(seed)
    keep = jax.random.bernoulli(key, 1.0 - p, (N, C))
    scale = jnp.asarray(1.0 / (1.0 - p), x.dtype)
    mask = jnp.where(keep, scale, jnp.asarray(0, x.dtype))          # (N, C)

    f = _fold_factor(T, C, sub_align)
    if f is not None:
        # ---- Path A: exact fold (N, T, C) -> (N, Tf, Cf), Cf % 128 == 0 ----
        Tf, Cf = T // f, C * f
        xf = x.reshape(N, Tf, Cf)
        maskf = (jnp.tile(mask, (1, f)) if f > 1 else mask).reshape(N, 1, Cf)
        Nb, tT, padded_blk = _choose_block_3d(N, Tf, Cf, itemsize, target_bytes)
        grid = (N // Nb, Tf // tT)
        mask_blk_bytes = Nb * sub_align * Cf * itemsize
        in_specs = [
            pl.BlockSpec((Nb, tT, Cf), lambda b, t: (b, t, 0)),
            pl.BlockSpec((Nb, 1, Cf), lambda b, t: (b, 0, 0)),
        ]
        out_spec = pl.BlockSpec((Nb, tT, Cf), lambda b, t: (b, t, 0))
        out_shape = jax.ShapeDtypeStruct((N, Tf, Cf), x.dtype)
        operands = (xf, maskf)
        mask_hbm_bytes = N * Cf * itemsize
    else:
        # ---- Path B: flatten to (N, T*C); lane-dense column blocks, ragged
        # tail masked by Pallas (no wrapper-side pad copy). ----
        TC = T * C
        xf = x.reshape(N, TC)
        Nb, W, padded_blk = _choose_block_2d(N, TC, C, itemsize, target_bytes)
        maskW = jnp.tile(mask, (1, W // C))                          # W % C == 0
        grid = (_cdiv(N, Nb), _cdiv(TC, W))
        mask_blk_bytes = padded_blk
        in_specs = [
            pl.BlockSpec((Nb, W), lambda b, j: (b, j)),
            pl.BlockSpec((Nb, W), lambda b, j: (b, 0)),
        ]
        out_spec = pl.BlockSpec((Nb, W), lambda b, j: (b, j))
        out_shape = jax.ShapeDtypeStruct((N, TC), x.dtype)
        operands = (xf, maskW)
        mask_hbm_bytes = N * W * itemsize

    # Live VMEM: 2 buffers x (x block + out block) + 2 x mask block + slack.
    vmem_needed = 4 * padded_blk + 2 * mask_blk_bytes + (1 << 20)
    out = pl.pallas_call(
        _dropout_mul_kernel,
        out_shape=out_shape,
        grid=grid,
        in_specs=in_specs,
        out_specs=out_spec,
        compiler_params=pltpu.CompilerParams(
            dimension_semantics=("parallel", "parallel"),
            vmem_limit_bytes=max(vmem_limit, vmem_needed)),
        cost_estimate=pl.CostEstimate(
            flops=N * T * C,
            transcendentals=0,
            bytes_accessed=2 * N * T * C * itemsize + mask_hbm_bytes),
        input_output_aliases=({0: 0} if donate_input else {}),
    )(*operands)
    return out.reshape(N, T, C)


def _check_columns(x, y, p):
    """Every (n, c) column is all-zero or all equal to x[:, :, c] / (1-p)."""
    scale = 1.0 / (1.0 - p)
    col_zero = jnp.all(y == 0.0, axis=1)                            # (N, C)
    col_scaled = jnp.all(jnp.abs(y - x * scale) < 1e-5, axis=1)     # (N, C)
    return bool(jnp.all(col_zero | col_scaled))


if __name__ == "__main__":
    p = 0.5

    # Main case: C=32 -> fold f=4 gives a lane-dense (.., 128) last dim (path A).
    N, T, C = 2, 8, 32
    x = jax.random.normal(jax.random.PRNGKey(0), (N, T, C), dtype=jnp.float32)
    y = jax.block_until_ready(spatial_dropout1d(x, p=p, seed=42, training=True))
    assert y.shape == x.shape and y.dtype == x.dtype
    assert _check_columns(x, y, p), "column mask semantics violated (path A)"

    # Fallback: C=40 has no 128-multiple fold -> flattened lane-dense path B.
    x2 = jax.random.normal(jax.random.PRNGKey(1), (3, 6, 40), dtype=jnp.float32)
    y2 = jax.block_until_ready(spatial_dropout1d(x2, p=p, seed=7, training=True))
    assert _check_columns(x2, y2, p), "column mask semantics violated (path B)"

    # Path B with multiple column blocks + ragged tail (TC=2000, block W=640).
    x4 = jax.random.normal(jax.random.PRNGKey(3), (2, 50, 40), dtype=jnp.float32)
    y4 = jax.block_until_ready(spatial_dropout1d(x4, p=p, seed=5, training=True))
    assert _check_columns(x4, y4, p), "column mask semantics violated (path B ragged)"

    # Larger path-A shape exercising the >=4-grid-step / tiling logic.
    x3 = jax.random.normal(jax.random.PRNGKey(2), (4, 512, 256), dtype=jnp.float32)
    y3 = jax.block_until_ready(spatial_dropout1d(x3, p=0.3, seed=11, training=True))
    assert _check_columns(x3, y3, 0.3), "column mask semantics violated (large)"

    # Eval mode is identity; p=1 zeros everything (matches nn.Dropout2d).
    assert bool(jnp.all(spatial_dropout1d(x, p=p, training=False) == x))
    assert bool(jnp.all(spatial_dropout1d(x, p=1.0, seed=3, training=True) == 0.0))

    print("KERNEL_OK")
</pallas_src>

<mosaic_0001>
module attributes {stable_mosaic.version = 11 : i64} {
  func.func @_dropout_mul_kernel(%arg0: i32, %arg1: i32, %arg2: memref<1x2x128xf32, #tpu.memory_space<vmem>>, %arg3: memref<1x1x128xf32, #tpu.memory_space<vmem>>, %arg4: memref<1x2x128xf32, #tpu.memory_space<vmem>>) attributes {dimension_semantics = [#tpu.dimension_semantics<parallel>, #tpu.dimension_semantics<parallel>], iteration_bounds = array<i64: 2, 1>, scalar_prefetch = 0 : i64, scratch_operands = 0 : i64, tpu.core_type = #tpu.core_type<tc>, window_params = [{transform_indices = @transform_0, window_bounds = array<i64: 1, 2, 128>}, {transform_indices = @transform_1, window_bounds = array<i64: 1, 1, 128>}, {transform_indices = @transform_2, window_bounds = array<i64: 1, 2, 128>}]} {
    %c0 = arith.constant 0 : index
    %c0_0 = arith.constant 0 : index
    %c0_1 = arith.constant 0 : index
    %0 = vector.load %arg2[%c0, %c0_0, %c0_1] : memref<1x2x128xf32, #tpu.memory_space<vmem>>, vector<1x2x128xf32>
    %c0_2 = arith.constant 0 : index
    %c0_3 = arith.constant 0 : index
    %c0_4 = arith.constant 0 : index
    %1 = vector.load %arg3[%c0_2, %c0_3, %c0_4] : memref<1x1x128xf32, #tpu.memory_space<vmem>>, vector<1x1x128xf32>
    %2 = vector.broadcast %1 : vector<1x1x128xf32> to vector<1x2x128xf32>
    %3 = arith.mulf %0, %2 : vector<1x2x128xf32>
    %c0_5 = arith.constant 0 : index
    %c0_6 = arith.constant 0 : index
    %c0_7 = arith.constant 0 : index
    %4 = vector.load %arg4[%c0_5, %c0_6, %c0_7] : memref<1x2x128xf32, #tpu.memory_space<vmem>>, vector<1x2x128xf32>
    tpu.vector_store %arg4[%c0_5, %c0_6, %c0_7], %3 {strides = array<i32>} : memref<1x2x128xf32, #tpu.memory_space<vmem>>, vector<1x2x128xf32>,
    return
  }
  func.func @transform_0(%arg0: i32, %arg1: i32) -> (i32, i32, i32) {
    %c0_i32 = arith.constant 0 : i32
    %c0_i32_0 = arith.constant 0 : i32
    return %arg0, %arg1, %c0_i32 : i32, i32, i32
  }
  func.func @transform_1(%arg0: i32, %arg1: i32) -> (i32, i32, i32) {
    %c0_i32 = arith.constant 0 : i32
    %c0_i32_0 = arith.constant 0 : i32
    %c0_i32_1 = arith.constant 0 : i32
    return %arg0, %c0_i32, %c0_i32_0 : i32, i32, i32
  }
  func.func @transform_2(%arg0: i32, %arg1: i32) -> (i32, i32, i32) {
    %c0_i32 = arith.constant 0 : i32
    %c0_i32_0 = arith.constant 0 : i32
    return %arg0, %arg1, %c0_i32 : i32, i32, i32
  }
}

</mosaic_0001>

<bundles_post_ra>
// kernel: tpu_custom_call.1
= control target key start
LH: loop header
LB: loop body
LE: loop exit
PB: predicated region body
PF: predicated region fallthrough
CT: control target
= control target key end

     0   :  { %7 = vsyncpa [#allocation3], 0  ;;  %s688_s0 = inlined_call_operand.hbm [shape: f32[2,2,128], index: 0, kind: input, shape index: {}]   ;;  %s689_s1 = inlined_call_operand.vmem [shape: f32[2,1,128], index: 1, kind: input, shape index: {}]   ;;  %s690_s2 = inlined_call_operand.hbm [shape: f32[2,2,128], index: 2, kind: output, shape index: {}]  }
   0x1   :  { %9 = vsyncpa [#allocation3 + $0x1], 0 }
   0x2   :  { %10 = vsyncpa [#allocation4], 0 }
   0x3   :  { %12 = vsyncpa [#allocation4 + $0x1], 0  ;;  %s511_s9 = smov 0   ;;  %s513_s10 = smov 0  }
   0x4   :  { %s515_s11 = smov 0   ;;  %s517_s12 = smov 0  }
   0x5   :  { %s519_s13 = smov 0   ;;  %s521_s14 = smov 0  }
   0x6 LB: > { %s304_s15 = sadd.s32 4294967295, %s492_s14   ;;  %s305_s16 = sadd.s32 4294967294, %s492_s14   ;;  %s492_s14 = sphi %s521_s14, %s18_s14   ;;  %s488_s13 = sphi %s519_s13, %s706_s13   ;;  %s484_s12 = sphi %s517_s12, %s705_s12   ;;  %s480_s11 = sphi %s515_s11, %s704_s11   ;;  %s476_s10 = sphi %s513_s10, %s703_s10   ;;  %s472_s9 = sphi %s511_s9, %s702_s9  }
   0x7   : > { %s30_s17 = sadd.s32 1, %s488_s13  ;;  %s39_s18 = sadd.s32 1, %s480_s11 }
   0x8   : > { %p32_p0 = scmp.ge.s32.totalorder %s30_s17, 2  ;;  %p46_p1 = scmp.ne.s32.totalorder %s480_s11, %s476_s10 }
   0x9   : > { %p47_p2 = scmp.eq.s32.totalorder %s492_s14, 0  ;;  %p52_p3 = scmp.ne.s32.totalorder %s476_s10, %s472_s9 }
   0xa   : > { %s708_s17 = smov (%p32_p0, %s30_s17), 0  ;;  %p53_p5 = scmp.eq.s32.totalorder %s304_s15, 0 }
   0xb   : > { %p552_p4 = por %p47_p2, %p46_p1  ;;  %s34_s20 = ssub.s32 %s488_s13, %s708_s17 }
   0xc   : > { %p104_p6 = scmp.eq.s32.totalorder %s304_s15, 1  ;;  %p37_p7 = scmp.eq.s32.totalorder %s34_s20, 0 }
   0xd   : > { %p558_p8 = por %p53_p5, %p52_p3  ;;  %p110_p10 = scmp.eq.s32.totalorder %s305_s16, 1 }
   0xe   : > { %p562_p9 = por %p104_p6, %p46_p1  ;;  %p330_p13 = scmp.lt.s32.totalorder %s492_s14, 2 }
   0xf   : > { %s567_s23 = scalar_select %p37_p7, %s480_s11, %s39_s18  }
  0x10   : > { %s694_s22 = scalar_select %p562_p9, 1, 0 }
  0x11   : > { %p569_p11 = por %p110_p10, %p52_p3  ;;  %s130_s25 = sand.u32 1, %s480_s11  }
  0x12   : > { %s308_s26 = sshll.u32 %s130_s25, 1  ;;  %s309_s27 = sshll.u32 %s488_s13, 5 }
  0x13   : > { %s695_s24 = scalar_select %p569_p11, 1, 0 }
  0x14   : > { %s580_s30 = scalar_lea.hbm %s688_s0, %s309_s27  ;;  %s134_s3 = scalar_lea.vmem [#allocation2], %s308_s26 }
  0x15   : > { %s142_s4 = sshll.u32 %s134_s3, 4  ;;  %p586_p0 = pnand %p330_p13, %p552_p4  ;;  %s582_s4 = int_to_ptr.vmem [resolvable:$true] %s142_s4 }
  0x16   : > { %s131_s6 = scalar_lea.sflag [#allocation3], %s130_s25  ;;  %s380_s7 = scalar_lea.hbm %s580_s30, 32 }
  0x17   : > { %p381_p3 = scmp.ne.s32.totalorder %s580_s30, %s380_s7  ;;  %p382_p5 = pneg %p586_p0 }
  0x18   : > { %s385_s16 = scalar_lea.hbm %s688_s0, 64  ;;  %p386_p4 = scmp.lt.u32.totalorder %s580_s30, %s688_s0 }
  0x19   : > { %p383_p6 = pnand %p382_p5, %p381_p3  ;;  %p387_p10 = scmp.lt.u32.totalorder %s385_s16, %s380_s7 }
  0x1a   : > { %p389_p12 = scmp.lt.u32.totalorder %s380_s7, %s580_s30 }
  0x1b   : > { %p384_p7 = pneg %p383_p6  ;;  %p388_p13 = por %p387_p10, %p386_p4 }
  0x1d   : > { %p390_p1 = por %p389_p12, %p388_p13 }
  0x1f   : > { %p391_p2 = pnand %p390_p1, %p384_p7 }
  0x21   : > { %394 = shalt.err (!%p391_p2)
}
  0x22   : > { %s395_s20 = scalar_lea.vmem %s582_s4, 32  ;;  %s494_s25 = smov [#allocation2]  }
  0x23   : > { %p396_p3 = scmp.ne.s32.totalorder %s582_s4, %s395_s20  ;;  %s400_s26 = sshll.u32 %s494_s25, 4  ;;  %s401_s26 = int_to_ptr.vmem [resolvable:$false] %s400_s26 }
  0x24   : > { %s402_s27 = scalar_lea.vmem %s401_s26, 64  ;;  %p403_p9 = scmp.lt.s32.totalorder %s582_s4, %s401_s26 }
  0x25   : > { %p398_p6 = pnand %p396_p3, %p382_p5  ;;  %p404_p4 = scmp.lt.s32.totalorder %s402_s27, %s395_s20 }
  0x27   : > { %p399_p11 = pneg %p398_p6  ;;  %p405_p10 = por %p404_p4, %p403_p9 }
  0x29   : > { %p406_p12 = pnand %p405_p10, %p399_p11 }
  0x2b   : > { %409 = shalt.err (!%p406_p12)
}
  0x2c   : > { %325 = dma.hbm_to_vmem [thread:$0]  (!%p586_p0), %s580_s30, 32, %s582_s4, %s131_s6  }
  0x2d   : > { %p697_p1 = scmp.lt.s32.totalorder %s492_s14, 3  ;;  %p698_p2 = scmp.ge.s32.totalorder %s492_s14, 1 }
  0x2f   : > { %p154_p5 = pnand %p698_p2, %p697_p1 }
  0x30   : > { %s622_s28 = sand.u32 (!%p154_p5), 1, %s476_s10  }
  0x31   : > { %157 = sbr.rel (%p154_p5) target bundleno = 85 (0x55), region = 28  ;;  %s311_s29 = sshll.u32 (!%p154_p5), %s622_s28, 1 }
  0x32   : > { %s160_s3 = scalar_lea.sflag (!%p154_p5), [#allocation3], %s622_s28  ;;  %s163_s7 = scalar_lea.vmem (!%p154_p5), [#allocation2], %s311_s29 }
  0x38   : > { %463 = dma.done.wait (%p558_p8), %s160_s3, 32  }
  0x39   : > { %465 = vsyncadd (%p558_p8), %s160_s3, 4294967264  ;;  %p187_p9 = scmp.lt.s32.totalorder %s484_s12, 1  ;;  %s186_s8 = scalar_lea.vmem [#allocation5], %s311_s29  ;;  %v190_v0 = vld [vmem:[%s163_s7] sm:$0x3] }
  0x3a   : > { %s215_s15 = sshll.u32 %s186_s8, 4  ;;  %s315_s16 = sshll.u32 %s484_s12, 5  ;;  %s636_s15 = int_to_ptr.vmem [resolvable:$true] %s215_s15 }
  0x3b   : > { %s188_s30 = scalar_select %p187_p9, %s484_s12, 1 }
  0x3c   : > { %s641_s19 = scalar_lea.hbm %s690_s2, %s315_s16  ;;  %s201_s20 = scalar_lea.sflag [#allocation4], %s622_s28 }
  0x3d   : > { %s189_s6 = scalar_lea.vmem %s689_s1, %s188_s30  ;;  %s410_s25 = scalar_lea.vmem %s636_s15, 32 }
  0x3e   : > { %v313_v1 = vld [vmem:[%s189_s6] ss:$0 sm:$0xff]  ;;  %p411_p8 = scmp.ne.s32.totalorder %s636_s15, %s410_s25  ;;  %p699_p11 = scmp.ne.s32.totalorder %s694_s22, 0 }
  0x3f   : > { %v198_v2 = vmul.f32 %v313_v1, %v190_v0  ;;  %s495_s12 = smov [#allocation5]  }
  0x40   : > { %p412_p0 = pnand %p411_p8, %p699_p11  ;;  %s414_s26 = sshll.u32 %s495_s12, 4  ;;  %s415_s26 = int_to_ptr.vmem [resolvable:$false] %s414_s26 }
  0x41   : > { %199 = vst [vmem:[%s186_s8] sm:$0x3] %v198_v2  ;;  %s416_s27 = scalar_lea.vmem %s415_s26, 64  ;;  %p417_p13 = scmp.lt.s32.totalorder %s636_s15, %s415_s26 }
  0x42   : > { %p413_p7 = pneg %p412_p0  ;;  %p418_p3 = scmp.lt.s32.totalorder %s416_s27, %s410_s25 }
  0x44   : > { %p419_p6 = por %p418_p3, %p417_p13 }
  0x46   : > { %p420_p4 = pnand %p419_p6, %p413_p7 }
  0x48   : > { %423 = shalt.err (!%p420_p4)
}
  0x49   : > { %s424_s28 = scalar_lea.hbm %s641_s19, 32  ;;  %s428_s7 = scalar_lea.hbm %s690_s2, 64 }
  0x4a   : > { %p425_p10 = scmp.ne.s32.totalorder %s641_s19, %s424_s28  ;;  %p429_p2 = scmp.lt.u32.totalorder %s641_s19, %s690_s2 }
  0x4b   : > { %p430_p5 = scmp.lt.u32.totalorder %s428_s7, %s424_s28  ;;  %p432_p8 = scmp.lt.u32.totalorder %s424_s28, %s641_s19 }
  0x4c   : > { %p426_p12 = pnand %p425_p10, %p699_p11 }
  0x4d   : > { %p431_p9 = por %p430_p5, %p429_p2 }
  0x4e   : > { %p427_p1 = pneg %p426_p12 }
  0x4f   : > { %p433_p0 = por %p432_p8, %p431_p9 }
  0x51   : > { %p434_p7 = pnand %p433_p0, %p427_p1 }
  0x53   : > { %437 = shalt.err (!%p434_p7)
}
  0x54   : > { %320 = dma.vmem_to_hbm [thread:$0]  (%p699_p11), %s636_s15, 32, %s641_s19, %s201_s20  }
  0x55 PF: > { %s227_s5 = sand.u32 1, %s472_s9   ;;  %p700_p13 = scmp.ne.s32.totalorder %s695_s24, 0 }
  0x56   : > { %p701_p3 = scmp.ge.s32.totalorder %s492_s14, 2  ;;  %s228_s6 = scalar_lea.sflag [#allocation4], %s227_s5 }
  0x58   : > { %p327_p6 = pnand %p701_p3, %p700_p13 }
  0x5a   : > { %467 = dma.done.wait (!%p327_p6), %s228_s6, 32  }
  0x5b   : > { %469 = vsyncadd (!%p327_p6), %s228_s6, 4294967264  ;;  %s18_s14 = sadd.s32 1, %s492_s14   ;;  %s702_s9 = smov %s476_s10 }
  0x5c   : > { %p15_p4 = scmp.ge.s32.totalorder %s18_s14, 4   ;;  %s703_s10 = smov %s480_s11 }
  0x5d   : > { %s704_s11 = smov %s567_s23  ;;  %s705_s12 = smov %s488_s13 }
  0x5e   : > { %s706_s13 = smov %s708_s17  ;;  %17 = sbr.rel (!%p15_p4) target bundleno = 6 (0x6), region = 76 }
  0x65   :  { %233 = vsyncpa [#allocation3], 1 }
  0x66   :  { %235 = vsyncpa [#allocation3 + $0x1], 1 }
  0x67   :  { %236 = vsyncpa [#allocation4], 1 }
  0x68   :  { %238 = vsyncpa [#allocation4 + $0x1], 1 }

</bundles_post_ra>
